<compile_context>
chip_gen: v5e
topology: v5e:2x2
jax: 0.10.0
libtpu: 0.0.40
codegen_flags: <defaults>
</compile_context>

<pallas_src>
import functools

import jax
import jax.numpy as jnp
from jax.experimental import pallas as pl
from jax.experimental.pallas import tpu as pltpu


def _mean_kernel(x_ref, o_ref, acc_ref, *, inv_hw, hw, tk, mask_tail):
    # Grid: (row tiles [parallel], hw tiles [arbitrary reduction, innermost]).
    # x_ref: (tr, tk) tile of the (N*C, H*W) view.
    # o_ref: (tr, 1) output tile (resident across the reduction axis).
    # acc_ref: (tr, 1) f32 accumulator scratch.
    k = pl.program_id(1)

    @pl.when(k == 0)
    def _():
        acc_ref[...] = jnp.zeros_like(acc_ref)

    x = x_ref[...]
    if mask_tail:
        # Last hw tile overhangs the array; OOB lanes hold undefined data.
        # Zero them before reducing (correct even if the garbage is NaN/Inf).
        lane = jax.lax.broadcasted_iota(jnp.int32, x.shape, 1)
        x = jnp.where(lane < (hw - k * tk), x, jnp.zeros_like(x))

    # Sum over the lane (H*W) axis on the MXU: (tr, tk) @ (tk, 1) -> (tr, 1).
    ones = jnp.ones((x.shape[1], 1), dtype=x.dtype)
    acc_ref[...] += jnp.dot(x, ones, preferred_element_type=jnp.float32)

    @pl.when(k == pl.num_programs(1) - 1)
    def _():
        o_ref[...] = (acc_ref[...] * inv_hw).astype(o_ref.dtype)


def _default_per_buffer_budget_bytes():
    # Generation-aware but conservative: stay well under every generation's
    # default scoped-VMEM limit (v5e: 16 MiB, v6e/v7x: 32 MiB) once the 2x
    # pipeline double-buffering, output tile and scratch are counted.
    try:
        cap = pltpu.get_tpu_info().vmem_capacity_bytes
    except Exception:  # not on a TPU host / interpret mode
        cap = 64 * 1024 * 1024
    return min(4 * 1024 * 1024, cap // 16)


def _pick_row_tile(rows, max_tile=512):
    # Row tile must be a multiple of 8 (sublane constraint) or the full extent.
    # Prefer a divisor of `rows` so every block is exact (no OOB row reads),
    # and keep it <= max_tile so multiple row tiles exist for megacore sharding.
    if rows <= max_tile or rows % 8 != 0:
        return rows
    best = 8
    for t in range(8, max_tile + 1, 8):
        if rows % t == 0:
            best = t
    return best


def adaptive_avg_pool2d_1x1(x, *, per_buffer_budget_bytes=None):
    """Equivalent of torch.nn.AdaptiveAvgPool2d((1, 1)) on an NCHW tensor."""
    N, C, H, W = x.shape
    rows = N * C
    hw = H * W
    itemsize = jnp.dtype(x.dtype).itemsize
    inv_hw = 1.0 / float(hw)

    if per_buffer_budget_bytes is None:
        per_buffer_budget_bytes = _default_per_buffer_budget_bytes()

    # Free view of the contiguous NCHW buffer — no HBM transpose, no pad copy.
    x2d = x.reshape(rows, hw)

    tr = _pick_row_tile(rows)
    n_row = rows // tr
    tr_pad = -(-tr // 8) * 8          # sublane padding of the VMEM tile
    hw_pad = -(-hw // 128) * 128      # lane padding of the VMEM tile

    if 2 * tr_pad * hw_pad * itemsize <= per_buffer_budget_bytes:
        # Whole H*W extent fits one (double-buffered) block per row tile.
        tk = hw
        n_hw = 1
        mask_tail = False
    else:
        # Tile H*W in 128-lane multiples sized from the budget, accounting for
        # the 2x pipeline double-buffering; mask the ragged tail in-kernel.
        tk = (per_buffer_budget_bytes // (2 * tr_pad * itemsize)) // 128 * 128
        tk = max(128, tk)
        n_hw = -(-hw // tk)
        mask_tail = (hw % tk) != 0

    kernel = functools.partial(
        _mean_kernel, inv_hw=inv_hw, hw=hw, tk=tk, mask_tail=mask_tail)

    cost = pl.CostEstimate(
        flops=2 * rows * hw,
        transcendentals=0,
        bytes_accessed=rows * hw * itemsize + rows * itemsize,
    )

    out = pl.pallas_call(
        kernel,
        out_shape=jax.ShapeDtypeStruct((rows, 1), x.dtype),
        grid=(n_row, n_hw),
        in_specs=[pl.BlockSpec((tr, tk), lambda i, k: (i, k))],
        out_specs=pl.BlockSpec((tr, 1), lambda i, k: (i, 0)),
        scratch_shapes=[pltpu.VMEM((tr, 1), jnp.float32)],
        compiler_params=pltpu.CompilerParams(
            dimension_semantics=("parallel", "arbitrary")),
        cost_estimate=cost,
    )(x2d)

    return out.reshape(N, C, 1, 1)


if __name__ == "__main__":
    key = jax.random.PRNGKey(0)
    k0, k1, k2 = jax.random.split(key, 3)

    # Small deterministic input (batch=2, channels=4, spatial=16).
    x = jax.random.normal(k0, (2, 4, 16, 16), dtype=jnp.float32)
    y = jax.block_until_ready(adaptive_avg_pool2d_1x1(x))
    ref = jnp.mean(x, axis=(2, 3), keepdims=True)
    assert y.shape == (2, 4, 1, 1), y.shape
    assert jnp.allclose(y, ref, atol=1e-5, rtol=1e-5), "mismatch (small shape)"

    # The module's test-suite shape (1, 1280, 7, 7): row-tiled, single hw step.
    x1 = jax.random.normal(k1, (1, 1280, 7, 7), dtype=jnp.float32)
    y1 = jax.block_until_ready(adaptive_avg_pool2d_1x1(x1))
    ref1 = jnp.mean(x1, axis=(2, 3), keepdims=True)
    assert y1.shape == (1, 1280, 1, 1), y1.shape
    assert jnp.allclose(y1, ref1, atol=1e-5, rtol=1e-5), "mismatch (test shape)"

    # Exercise the hw-tiled reduction path with in-kernel tail masking.
    x2 = jax.random.normal(k2, (2, 8, 40, 40), dtype=jnp.float32)
    y2 = jax.block_until_ready(
        adaptive_avg_pool2d_1x1(x2, per_buffer_budget_bytes=16 * 1024))
    ref2 = jnp.mean(x2, axis=(2, 3), keepdims=True)
    assert jnp.allclose(y2, ref2, atol=1e-5, rtol=1e-5), "mismatch (tiled hw path)"

    print("KERNEL_OK")
</pallas_src>

<mosaic_0001>
module attributes {stable_mosaic.version = 11 : i64} {
  func.func @_mean_kernel(%arg0: i32, %arg1: i32, %arg2: memref<8x256xf32, #tpu.memory_space<vmem>>, %arg3: memref<8x1xf32, #tpu.memory_space<vmem>>, %arg4: memref<8x1xf32, #tpu.memory_space<vmem>>) attributes {dimension_semantics = [#tpu.dimension_semantics<parallel>, #tpu.dimension_semantics<arbitrary>], iteration_bounds = array<i64: 1, 1>, scalar_prefetch = 0 : i64, scratch_operands = 1 : i64, tpu.core_type = #tpu.core_type<tc>, window_params = [{transform_indices = @transform_0, window_bounds = array<i64: 8, 256>}, {transform_indices = @transform_1, window_bounds = array<i64: 8, 1>}]} {
    %c0_i32 = arith.constant 0 : i32
    %0 = arith.cmpi eq, %arg1, %c0_i32 : i32
    %1 = arith.extui %0 : i1 to i32
    %c0_i32_0 = arith.constant 0 : i32
    %2 = arith.cmpi ne, %1, %c0_i32_0 : i32
    scf.if %2 {
      %cst_9 = arith.constant 0.000000e+00 : f32
      %12 = vector.broadcast %cst_9 : f32 to vector<8x1xf32>
      %c0_10 = arith.constant 0 : index
      %c0_11 = arith.constant 0 : index
      %13 = vector.load %arg4[%c0_10, %c0_11] : memref<8x1xf32, #tpu.memory_space<vmem>>, vector<8x1xf32>
      tpu.vector_store %arg4[%c0_10, %c0_11], %12 {strides = array<i32>} : memref<8x1xf32, #tpu.memory_space<vmem>>, vector<8x1xf32>,
    } else {
    }
    %c0 = arith.constant 0 : index
    %c0_1 = arith.constant 0 : index
    %3 = vector.load %arg2[%c0, %c0_1] : memref<8x256xf32, #tpu.memory_space<vmem>>, vector<8x256xf32>
    %cst = arith.constant 1.000000e+00 : f32
    %4 = vector.broadcast %cst : f32 to vector<256x1xf32>
    %c0_2 = arith.constant 0 : index
    %c0_3 = arith.constant 0 : index
    %5 = vector.load %arg4[%c0_2, %c0_3] : memref<8x1xf32, #tpu.memory_space<vmem>>, vector<8x1xf32>
    %cst_4 = arith.constant dense<0.000000e+00> : vector<8x1xf32>
    %6 = tpu.matmul %3, %4, %cst_4 {dimension_numbers = #tpu.dot_dimension_numbers<[1], [0], [0], [1], [0, 0, 1, 1], [], []>} : vector<8x256xf32>, vector<256x1xf32>, vector<8x1xf32> -> vector<8x1xf32>
    %7 = arith.addf %5, %6 : vector<8x1xf32>
    %c0_5 = arith.constant 0 : index
    %c0_6 = arith.constant 0 : index
    %8 = vector.load %arg4[%c0_5, %c0_6] : memref<8x1xf32, #tpu.memory_space<vmem>>, vector<8x1xf32>
    tpu.vector_store %arg4[%c0_5, %c0_6], %7 {strides = array<i32>} : memref<8x1xf32, #tpu.memory_space<vmem>>, vector<8x1xf32>,
    %c0_i32_7 = arith.constant 0 : i32
    %9 = arith.cmpi eq, %arg1, %c0_i32_7 : i32
    %10 = arith.extui %9 : i1 to i32
    %c0_i32_8 = arith.constant 0 : i32
    %11 = arith.cmpi ne, %10, %c0_i32_8 : i32
    scf.if %11 {
      %c0_9 = arith.constant 0 : index
      %c0_10 = arith.constant 0 : index
      %12 = vector.load %arg4[%c0_9, %c0_10] : memref<8x1xf32, #tpu.memory_space<vmem>>, vector<8x1xf32>
      %cst_11 = arith.constant 3.906250e-03 : f32
      %13 = vector.broadcast %cst_11 : f32 to vector<8x1xf32>
      %14 = arith.mulf %12, %13 : vector<8x1xf32>
      %c0_12 = arith.constant 0 : index
      %c0_13 = arith.constant 0 : index
      %15 = vector.load %arg3[%c0_12, %c0_13] : memref<8x1xf32, #tpu.memory_space<vmem>>, vector<8x1xf32>
      tpu.vector_store %arg3[%c0_12, %c0_13], %14 {strides = array<i32>} : memref<8x1xf32, #tpu.memory_space<vmem>>, vector<8x1xf32>,
    } else {
    }
    return
  }
  func.func @transform_0(%arg0: i32, %arg1: i32) -> (i32, i32) {
    %c0_i32 = arith.constant 0 : i32
    return %arg0, %arg1 : i32, i32
  }
  func.func @transform_1(%arg0: i32, %arg1: i32) -> (i32, i32) {
    %c0_i32 = arith.constant 0 : i32
    %c0_i32_0 = arith.constant 0 : i32
    return %arg0, %c0_i32 : i32, i32
  }
}

</mosaic_0001>

<bundles_post_ra>
// kernel: tpu_custom_call.1
= control target key start
LH: loop header
LB: loop body
LE: loop exit
PB: predicated region body
PF: predicated region fallthrough
CT: control target
= control target key end

     0   :  { %6 = vsyncpa [#allocation4], 0  ;;  %s114_s9 = smov [#allocation3]   ;;  %s136_s0 = inlined_call_operand.hbm [shape: f32[8,256], index: 0, kind: input, shape index: {}]   ;;  %s137_s1 = inlined_call_operand.vmem [shape: f32[8,1], index: 1, kind: output, shape index: {}]  }
   0x1   :  { %s12_s8 = sshll.u32 %s136_s0, 4  ;;  %s14_s10 = sshll.u32 %s114_s9, 4  ;;  %s13_s8 = int_to_ptr.hbm [resolvable:$true] %s12_s8  ;;  %s15_s10 = int_to_ptr.vmem [resolvable:$true] %s14_s10 }
   0x2   :  { %17 = dma.hbm_to_vmem [thread:$0]  %s13_s8, 256, %s15_s10, [#allocation4]  }
   0x3   :  { %112 = dma.done.wait [#allocation4], 256  }
   0x4   :  { %113 = vsyncadd [#allocation4], 4294967040  ;;  %vm26_vm0 = vcmask 7168   ;;  %v115_v0 = vmov 1.0   ;;  %v116_v1 = vmov 0.0   ;;  %v28_v2 = vld [vmem:[#allocation3] sm:$0xff] }
   0x5   :  { %31 = vmatpush.msra.mxu0 %v115_v0  ;;  %51 = vmatpush.msra.mxu1 %v115_v0  ;;  %27 = vst.msk [vmem:[#allocation2] sm:$0xff] %vm26_vm0, %v116_v1  ;;  %v29_v3 = vld [vmem:[#allocation3 + $0x8] sm:$0xff] }
   0x7   :  { %32 = vmatpush.msra.mxu0 %v115_v0  ;;  %52 = vmatpush.msra.mxu1 %v115_v0 }
   0x9   :  { %33 = vmatpush.msra.mxu0 %v115_v0  ;;  %53 = vmatpush.msra.mxu1 %v115_v0 }
   0xb   :  { %34 = vmatpush.msra.mxu0 %v115_v0  ;;  %54 = vmatpush.msra.mxu1 %v115_v0 }
   0xc   :  { %v30_v5 = vld [vmem:[#allocation2] sm:$0xff] }
   0xd   :  { %35 = vmatpush.msra.mxu0 %v115_v0  ;;  %55 = vmatpush.msra.mxu1 %v115_v0 }
   0xf   :  { %36 = vmatpush.msra.mxu0 %v115_v0  ;;  %56 = vmatpush.msra.mxu1 %v115_v0 }
  0x11   :  { %37 = vmatpush.msra.mxu0 %v115_v0  ;;  %57 = vmatpush.msra.mxu1 %v115_v0 }
  0x13   :  { %38 = vmatpush.msra.mxu0 %v115_v0  ;;  %58 = vmatpush.msra.mxu1 %v115_v0 }
  0x15   :  { %39 = vmatpush.msra.mxu0 %v115_v0  ;;  %59 = vmatpush.msra.mxu1 %v115_v0 }
  0x17   :  { %40 = vmatpush.msra.mxu0 %v115_v0  ;;  %60 = vmatpush.msra.mxu1 %v115_v0 }
  0x19   :  { %41 = vmatpush.msra.mxu0 %v115_v0  ;;  %61 = vmatpush.msra.mxu1 %v115_v0 }
  0x1b   :  { %42 = vmatpush.msra.mxu0 %v115_v0  ;;  %62 = vmatpush.msra.mxu1 %v115_v0 }
  0x1d   :  { %43 = vmatpush.msra.mxu0 %v115_v0  ;;  %63 = vmatpush.msra.mxu1 %v115_v0 }
  0x1f   :  { %44 = vmatpush.msra.mxu0 %v115_v0  ;;  %64 = vmatpush.msra.mxu1 %v115_v0 }
  0x21   :  { %45 = vmatpush.msra.mxu0 %v115_v0  ;;  %65 = vmatpush.msra.mxu1 %v115_v0 }
  0x23   :  { %46 = vmatpush.msra.mxu0 %v115_v0  ;;  %66 = vmatpush.msra.mxu1 %v115_v0 }
  0x24   :  { %47 = vmatmul.f32.vlgmr.msra.gmra.mxu0 %v28_v2  ;;  %67 = vmatmul.f32.vlgmr.msra.gmra.mxu1 %v29_v3 }
  0xa1   :  { %v48_v4 = vpop.f32.mrf.mxu0  ;;  %v68_v6 = vpop.f32.mrf.mxu1 }
  0xa2   :  { %v69_v7 = vadd.f32 %v68_v6, %v48_v4 }
  0xa4   :  { %v71_v8 = vadd.f32 %v69_v7, %v30_v5 }
  0xa6   :  { %73 = vst.msk [vmem:[#allocation2] sm:$0xff] %vm26_vm0, %v71_v8 }
  0xad   :  { %v77_v9 = vld [vmem:[#allocation2] sm:$0xff] }
  0xae   :  { %v78_v10 = vmul.f32 0.00390625, %v77_v9 }
  0xb0   :  { %79 = vst.msk [vmem:[%s137_s1] sm:$0xff] %vm26_vm0, %v78_v10 }
  0xb1   :  { %84 = vsyncpa [#allocation4], 1 }

</bundles_post_ra>
